<compile_context>
chip_gen: v7x
topology: tpu7x:2x2x1
jax: 0.10.0
libtpu: 0.0.40
codegen_flags: <defaults>
</compile_context>

<pallas_src>
import jax
import jax.numpy as jnp
from jax.experimental import pallas as pl
from jax.experimental.pallas import tpu as pltpu

_EPS = 1e-05
_DEFAULT_TILE_BYTES = 8 * 1024 * 1024   # one x tile; resident VMEM ~= 4x this
_LANE_TILE_CAP = 4096                   # multiple of 128


def _frozen_bn_kernel(x_ref, scale_ref, bias_ref, o_ref):
    # x_ref: (TR, TL); scale_ref / bias_ref: (TR, 1) -> broadcast over lanes.
    o_ref[...] = (x_ref[...] * scale_ref[...] + bias_ref[...]).astype(o_ref.dtype)


def _choose_tiles(R, L, itemsize, tile_bytes):
    """Pick (row_tile, lane_tile) obeying the (8, 128) layout rule.

    Rows = fused N*C (sublane axis), lanes = H*W (lane axis).
    """
    # dtype-aware sublane packing: f32 packs 8 rows/vreg, bf16 16, int8/fp8 32.
    sub_mult = {4: 8, 2: 16, 1: 32}.get(itemsize, 8)

    # Lane axis: full extent when small enough (always legal, even if ragged),
    # otherwise a 128-multiple tile; the ragged last block is masked by Pallas.
    tl = L if L <= _LANE_TILE_CAP else _LANE_TILE_CAP

    # Sublane axis: fill the tile byte budget, rounded to the packing multiple.
    tr = max(sub_mult, tile_bytes // (tl * itemsize))
    if tr >= R:
        tr = R                                    # full extent: always legal
    else:
        tr = max(sub_mult, (tr // sub_mult) * sub_mult)
    return int(tr), int(tl)


def _pick_vmem_limit():
    """Generation-aware scoped-VMEM request (v7x: 64 MiB/TC, v5e/v6e: 128 MiB)."""
    try:
        cap = int(pltpu.get_tpu_info().vmem_capacity_bytes)
    except Exception:
        cap = 64 * 1024 * 1024                    # conservative (v7x-sized) fallback
    # Leave headroom for Mosaic internal scratch; never ask for more than 64 MiB.
    return int(min(max(cap - 16 * 1024 * 1024, 32 * 1024 * 1024), 64 * 1024 * 1024))


def frozen_batch_norm_2d(x, weight, bias, running_mean, running_var, *,
                         tile_bytes=_DEFAULT_TILE_BYTES, donate_x=False):
    """x: (N, C, H, W); params: (C,). Returns (N, C, H, W) with x's dtype."""
    N, C, H, W = x.shape
    HW = H * W
    R = N * C

    # Fold the frozen statistics once (C-sized prep, f32 for precision), then
    # broadcast along the batch dim so the kernel indexes a fused (N*C) row axis.
    w32 = weight.astype(jnp.float32)
    b32 = bias.astype(jnp.float32)
    rm32 = running_mean.astype(jnp.float32)
    rv32 = running_var.astype(jnp.float32)
    scale_c = w32 * jax.lax.rsqrt(rv32 + _EPS)    # (C,)
    fbias_c = b32 - rm32 * scale_c                # (C,)
    scale = jnp.broadcast_to(scale_c[None, :], (N, C)).reshape(R, 1)
    fbias = jnp.broadcast_to(fbias_c[None, :], (N, C)).reshape(R, 1)

    x2 = x.reshape(R, HW)
    itemsize = jnp.dtype(x.dtype).itemsize

    vmem_limit = _pick_vmem_limit()
    # 2x in-buffers + 2x out-buffers per tile, plus params/internal scratch.
    tile_bytes = max(1, min(tile_bytes, vmem_limit // 5))
    tr, tl = _choose_tiles(R, HW, itemsize, tile_bytes)

    grid = (pl.cdiv(R, tr), pl.cdiv(HW, tl))
    x_spec = pl.BlockSpec((tr, tl), lambda i, j: (i, j))
    p_spec = pl.BlockSpec((tr, 1), lambda i, j: (i, 0))

    cost = pl.CostEstimate(
        flops=2 * N * C * HW,
        transcendentals=0,
        bytes_accessed=2 * N * C * HW * itemsize + 2 * R * 4,
    )

    out2 = pl.pallas_call(
        _frozen_bn_kernel,
        out_shape=jax.ShapeDtypeStruct((R, HW), x.dtype),
        grid=grid,
        in_specs=[x_spec, p_spec, p_spec],
        out_specs=x_spec,
        compiler_params=pltpu.CompilerParams(
            # No accumulator: every output block is written exactly once, so
            # both axes are "parallel" (lets v7x's 2 TCs split either axis).
            dimension_semantics=("parallel", "parallel"),
            vmem_limit_bytes=vmem_limit,
        ),
        cost_estimate=cost,
        input_output_aliases=({0: 0} if donate_x else {}),
    )(x2, scale, fbias)

    return out2.reshape(N, C, H, W)


def _reference(x, weight, bias, running_mean, running_var):
    """Pure-JAX mirror of the PyTorch forward."""
    w = weight.reshape(1, -1, 1, 1).astype(jnp.float32)
    b = bias.reshape(1, -1, 1, 1).astype(jnp.float32)
    rv = running_var.reshape(1, -1, 1, 1).astype(jnp.float32)
    rm = running_mean.reshape(1, -1, 1, 1).astype(jnp.float32)
    scale = w * jax.lax.rsqrt(rv + _EPS)
    fbias = b - rm * scale
    return (x * scale + fbias).astype(x.dtype)


if __name__ == "__main__":
    key = jax.random.PRNGKey(0)

    def make_params(C, k):
        kw, kb, km, kv = jax.random.split(k, 4)
        weight = jnp.ones((C,), jnp.float32) + 0.1 * jax.random.normal(kw, (C,), jnp.float32)
        bias = 0.1 * jax.random.normal(kb, (C,), jnp.float32)
        running_mean = 0.1 * jax.random.normal(km, (C,), jnp.float32)
        running_var = jnp.ones((C,), jnp.float32) + 0.1 * jnp.abs(
            jax.random.normal(kv, (C,), jnp.float32))
        return weight, bias, running_mean, running_var

    cases = [
        # (shape, dtype, tile_bytes override (None -> default), atol)
        ((2, 4, 16, 16), jnp.float32, None, 1e-5),        # primary small case
        ((2, 4, 7, 7), jnp.float32, None, 1e-5),          # ragged small HW (49 lanes)
        ((2, 4, 65, 65), jnp.float32, None, 1e-5),        # HW > lane cap -> ragged lane tiles
        ((2, 20, 24, 40), jnp.float32, 64 * 1024, 1e-5),  # forces a partial sublane block
        ((2, 4, 16, 16), jnp.bfloat16, None, 2e-2),       # bf16 path (16-row packing)
    ]

    kx, kp = jax.random.split(key)
    for idx, (shape, dtype, tb, atol) in enumerate(cases):
        _, C, _, _ = shape
        kx, kxi = jax.random.split(kx)
        kp, kpi = jax.random.split(kp)
        x = jax.random.normal(kxi, shape, dtype=jnp.float32).astype(dtype)
        weight, bias, running_mean, running_var = make_params(C, kpi)
        kwargs = {} if tb is None else {"tile_bytes": tb}

        out = frozen_batch_norm_2d(x, weight, bias, running_mean, running_var, **kwargs)
        out = jax.block_until_ready(out)
        ref = _reference(x, weight, bias, running_mean, running_var)

        assert out.shape == shape, f"case {idx}: bad shape {out.shape}"
        assert out.dtype == x.dtype, f"case {idx}: bad dtype {out.dtype}"
        assert jnp.allclose(out.astype(jnp.float32), ref.astype(jnp.float32),
                            atol=atol, rtol=atol), f"case {idx}: value mismatch"

    print("KERNEL_OK")
</pallas_src>

<mosaic_0001>
module attributes {stable_mosaic.version = 11 : i64} {
  func.func @_frozen_bn_kernel(%arg0: i32, %arg1: i32, %arg2: memref<8x256xf32, #tpu.memory_space<vmem>>, %arg3: memref<8x1xf32, #tpu.memory_space<vmem>>, %arg4: memref<8x1xf32, #tpu.memory_space<vmem>>, %arg5: memref<8x256xf32, #tpu.memory_space<vmem>>) attributes {dimension_semantics = [#tpu.dimension_semantics<parallel>, #tpu.dimension_semantics<parallel>], iteration_bounds = array<i64: 1, 1>, scalar_prefetch = 0 : i64, scratch_operands = 0 : i64, tpu.core_type = #tpu.core_type<tc>, window_params = [{transform_indices = @transform_0, window_bounds = array<i64: 8, 256>}, {transform_indices = @transform_1, window_bounds = array<i64: 8, 1>}, {transform_indices = @transform_2, window_bounds = array<i64: 8, 1>}, {transform_indices = @transform_3, window_bounds = array<i64: 8, 256>}]} {
    %c0 = arith.constant 0 : index
    %c0_0 = arith.constant 0 : index
    %0 = vector.load %arg2[%c0, %c0_0] : memref<8x256xf32, #tpu.memory_space<vmem>>, vector<8x256xf32>
    %c0_1 = arith.constant 0 : index
    %c0_2 = arith.constant 0 : index
    %1 = vector.load %arg3[%c0_1, %c0_2] : memref<8x1xf32, #tpu.memory_space<vmem>>, vector<8x1xf32>
    %2 = vector.broadcast %1 : vector<8x1xf32> to vector<8x256xf32>
    %3 = arith.mulf %0, %2 : vector<8x256xf32>
    %c0_3 = arith.constant 0 : index
    %c0_4 = arith.constant 0 : index
    %4 = vector.load %arg4[%c0_3, %c0_4] : memref<8x1xf32, #tpu.memory_space<vmem>>, vector<8x1xf32>
    %5 = vector.broadcast %4 : vector<8x1xf32> to vector<8x256xf32>
    %6 = arith.addf %3, %5 : vector<8x256xf32>
    %c0_5 = arith.constant 0 : index
    %c0_6 = arith.constant 0 : index
    %7 = vector.load %arg5[%c0_5, %c0_6] : memref<8x256xf32, #tpu.memory_space<vmem>>, vector<8x256xf32>
    tpu.vector_store %arg5[%c0_5, %c0_6], %6 {strides = array<i32>} : memref<8x256xf32, #tpu.memory_space<vmem>>, vector<8x256xf32>,
    return
  }
  func.func @transform_0(%arg0: i32, %arg1: i32) -> (i32, i32) {
    %c0_i32 = arith.constant 0 : i32
    return %arg0, %arg1 : i32, i32
  }
  func.func @transform_1(%arg0: i32, %arg1: i32) -> (i32, i32) {
    %c0_i32 = arith.constant 0 : i32
    %c0_i32_0 = arith.constant 0 : i32
    return %arg0, %c0_i32 : i32, i32
  }
  func.func @transform_2(%arg0: i32, %arg1: i32) -> (i32, i32) {
    %c0_i32 = arith.constant 0 : i32
    %c0_i32_0 = arith.constant 0 : i32
    return %arg0, %c0_i32 : i32, i32
  }
  func.func @transform_3(%arg0: i32, %arg1: i32) -> (i32, i32) {
    %c0_i32 = arith.constant 0 : i32
    return %arg0, %arg1 : i32, i32
  }
}

</mosaic_0001>

<bundles_post_ra>
// kernel: tpu_custom_call.1
= control target key start
LH: loop header
LB: loop body
LE: loop exit
PB: predicated region body
PF: predicated region fallthrough
CT: control target
= control target key end

     0   :  { %s122_s0 = inlined_call_operand.vmem [shape: f32[8,256], index: 0, kind: input, shape index: {}]   ;;  %s123_s1 = inlined_call_operand.vmem [shape: f32[8,1], index: 1, kind: input, shape index: {}]   ;;  %s124_s2 = inlined_call_operand.vmem [shape: f32[8,1], index: 2, kind: input, shape index: {}]   ;;  %s125_s3 = inlined_call_operand.hbm [shape: f32[8,256], index: 3, kind: output, shape index: {}]  }
   0x1   :  { %v17_v0 = vld [vmem:[%s123_s1] sm:$0xff] }
   0x2   :  { %8 = vsyncpa [#allocation3], 0  ;;  %v76_v1 = vmov 0   ;;  %v25_v2 = vld [vmem:[%s124_s2] sm:$0xff]  ;;  %v16_v5 = vld [vmem:[%s122_s0 + $0x8] sm:$0xff]  ;;  %s77_s20 = smov [#allocation2]  }
   0x3   :  { %51 = vset.pattern.permute.xlu0 %v76_v1  ;;  %v15_v4 = vld [vmem:[%s122_s0] sm:$0xff]  ;;  %s41_s1 = sshll.u32 %s77_s20, 4  ;;  %s42_s1 = int_to_ptr.vmem [resolvable:$true] %s41_s1 }
   0x4   :  { %20 = vperm.xlu0 %51, %v17_v0   ;;  %s52_s2 = scalar_lea.vmem %s42_s1, 256  ;;  %p57_p1 = scmp.lt.s32.totalorder %s42_s1, %s42_s1 }
   0x5   :  { %p53_p0 = scmp.ne.s32.totalorder %s42_s1, %s52_s2  ;;  %p58_p2 = scmp.lt.s32.totalorder %s52_s2, %s52_s2 }
   0x7   :  { %p59_p3 = por %p58_p2, %p57_p1 }
   0x8   :  { %28 = vperm.xlu0 %51, %v25_v2  }
   0x9   :  { %p60_p4 = pnand %p59_p3, %p53_p0 }
  0x83   :  { %v21_v3 = vpop.permute.xlu0 %20 }
  0x84   :  { %v23_v6 = vmul.f32 %v21_v3, %v15_v4  ;;  %v24_v7 = vmul.f32 %v21_v3, %v16_v5 }
  0x87   :  { %v29_v8 = vpop.permute.xlu0 %28 }
  0x88   :  { %v31_v9 = vadd.f32 %v29_v8, %v23_v6  ;;  %v32_v10 = vadd.f32 %v29_v8, %v24_v7 }
  0x8a   :  { %33 = vst [vmem:[#allocation2] sm:$0xff] %v31_v9  ;;  %34 = vst [vmem:[#allocation2 + $0x8] sm:$0xff] %v32_v10 }
  0x8b   :  { %63 = shalt.err (!%p60_p4)
}
  0x8c   :  { %s64_s0 = scalar_lea.hbm %s125_s3, 256 }
  0x8d   :  { %p65_p5 = scmp.ne.s32.totalorder %s125_s3, %s64_s0  ;;  %p68_p6 = scmp.lt.u32.totalorder %s64_s0, %s125_s3 }
  0x8f   :  { %p70_p7 = pnand %p68_p6, %p65_p5 }
  0x91   :  { %73 = shalt.err (!%p70_p7)
}
  0x92   :  { %44 = dma.vmem_to_hbm [thread:$0]  %s42_s1, 256, %s125_s3, [#allocation3]  }
  0x93   :  { %74 = dma.done.wait [#allocation3], 256  }
  0x94   :  { %75 = vsyncadd [#allocation3], 4294967040 }
  0x95   :  { %48 = vsyncpa [#allocation3], 1 }

</bundles_post_ra>
